<compile_context>
chip_gen: v7x
topology: tpu7x:2x2x1
jax: 0.10.0
libtpu: 0.0.40
codegen_flags: <defaults>
</compile_context>

<pallas_src>
import jax
import jax.numpy as jnp
from jax.experimental import pallas as pl
from jax.experimental.pallas import tpu as pltpu


# ---------------------------------------------------------------------------
# Kernel
# ---------------------------------------------------------------------------
def _attention_kernel(g_ref, x_ref, wg_ref, wx_ref, b_ref, wp_ref, bp_ref, o_ref):
    """One grid step over a (bn, C, tm) pixel block; BN already folded into weights."""
    wg = wg_ref[...]            # (F, Cg) f32
    wx = wx_ref[...]            # (F, Cx) f32
    b = b_ref[...]              # (F, 1)  f32  (combined bias bg + bx)
    wp = wp_ref[...]            # (F, 1)  f32
    bp = bp_ref[0]              # scalar  f32  (SMEM)

    bn = g_ref.shape[0]         # static; small (<= max_batch_per_step)
    for j in range(bn):
        g = g_ref[j].astype(jnp.float32)        # (Cg, tm)
        x = x_ref[j].astype(jnp.float32)        # (Cx, tm)

        # 1x1 convs (BN folded) -> (F, tm), f32 accumulation on the MXU.
        pre = jnp.dot(wg, g, preferred_element_type=jnp.float32)
        pre = pre + jnp.dot(wx, x, preferred_element_type=jnp.float32)
        r = jnp.maximum(pre + b, 0.0)           # ReLU; (F,1) bias broadcasts

        # psi conv (F -> 1): VPU multiply + sublane reduce (skip width-1 MXU op).
        psi = jnp.sum(r * wp, axis=0, keepdims=True) + bp      # (1, tm)
        psi = jax.nn.sigmoid(psi)

        # Broadcast psi over x's channels; lane-dense store.
        o_ref[j] = (x * psi).astype(o_ref.dtype)


# ---------------------------------------------------------------------------
# Tiling helpers
# ---------------------------------------------------------------------------
def _round_up(v, m):
    return ((v + m - 1) // m) * m


def _sublane_pad(c, itemsize):
    mult = {4: 8, 2: 16, 1: 32}.get(itemsize, 8)
    return _round_up(c, mult)


# ---------------------------------------------------------------------------
# Wrapper
# ---------------------------------------------------------------------------
def attention_block_pallas(g_nchw, x_nchw, params, *,
                           vmem_budget_bytes=24 << 20,   # keep <= ~32 MiB on v7x
                           max_batch_per_step=16,
                           min_grid_steps=2):
    """g_nchw: (N, Cg, H, W), x_nchw: (N, Cx, H, W)  ->  (N, Cx, H, W)."""
    N, Cg, H, W = g_nchw.shape
    Nx, Cx, Hx, Wx = x_nchw.shape
    assert (N, H, W) == (Nx, Hx, Wx)
    F = params["wg"].shape[0]
    HW = H * W
    itm = jnp.dtype(x_nchw.dtype).itemsize

    # NCHW is already channels-first; just flatten spatial dims (no copies).
    g3 = g_nchw.reshape(N, Cg, HW)
    x3 = x_nchw.reshape(N, Cx, HW)

    # ---- VMEM-budget-driven tile sizing --------------------------------
    # Per-pixel VMEM cost: double-buffered g/x/out blocks (sublane-padded, input
    # dtype) + f32 intermediates the compiler keeps live (upcasts, pre/r, psi).
    per_pixel = 2 * itm * (_sublane_pad(Cg, itm) + 2 * _sublane_pad(Cx, itm))
    per_pixel += 4 * (_sublane_pad(Cg, 4) + _sublane_pad(Cx, 4)
                      + 2 * _sublane_pad(F, 4) + 8)
    pix_budget = max(128, vmem_budget_bytes // per_pixel)   # pixels per grid step

    if N > 1 and HW <= pix_budget // 2:
        # Small-spatial gate: pack several batch images per grid step.
        bn = int(min(N, max_batch_per_step, pix_budget // HW))
        tm = HW
    else:
        bn = 1
        tm = HW if HW <= pix_budget else max(128, (pix_budget // 128) * 128)

    # Keep >= min_grid_steps so multi-TensorCore chips (v7x) shard the grid.
    def n_steps(bn_, tm_):
        return pl.cdiv(N, bn_) * pl.cdiv(HW, tm_)

    if n_steps(bn, tm) < min_grid_steps:
        if N >= min_grid_steps:
            bn = pl.cdiv(N, min_grid_steps)
        elif HW >= 128 * min_grid_steps:
            tm = _round_up(pl.cdiv(HW, min_grid_steps), 128)

    grid = (pl.cdiv(N, bn), pl.cdiv(HW, tm))

    pix_spec = lambda c: pl.BlockSpec((bn, c, tm), lambda b, i: (b, 0, i))
    const_spec = lambda shape: pl.BlockSpec(shape, lambda b, i: (0, 0))

    cost = pl.CostEstimate(
        flops=2 * F * (Cg + Cx + 1) * N * HW,
        transcendentals=N * HW,
        bytes_accessed=(Cg + 2 * Cx) * N * HW * itm,
    )

    out3 = pl.pallas_call(
        _attention_kernel,
        out_shape=jax.ShapeDtypeStruct((N, Cx, HW), x_nchw.dtype),
        grid_spec=pltpu.PrefetchScalarGridSpec(
            num_scalar_prefetch=0,
            grid=grid,
            in_specs=[
                pix_spec(Cg),                 # g tile   (bn, Cg, tm)
                pix_spec(Cx),                 # x tile   (bn, Cx, tm)
                const_spec((F, Cg)),          # wg' = ag * Wg
                const_spec((F, Cx)),          # wx' = ax * Wx
                const_spec((F, 1)),           # b   = bg + bx
                const_spec((F, 1)),           # wp' = ap * Wp
                pl.BlockSpec(memory_space=pltpu.MemorySpace.SMEM),   # bp scalar
            ],
            out_specs=pix_spec(Cx),
        ),
        compiler_params=pltpu.CompilerParams(
            dimension_semantics=("parallel", "parallel"),
            vmem_limit_bytes=max(32 << 20,
                                 min(vmem_budget_bytes + (16 << 20), 112 << 20)),
        ),
        cost_estimate=cost,
    )(g3, x3, params["wg"], params["wx"], params["b"], params["wp"], params["bp"])

    return out3.reshape(N, Cx, H, W)


# ---------------------------------------------------------------------------
# Parameters: raw (conv + BN) and folded (kernel) forms
# ---------------------------------------------------------------------------
def make_raw_params(key, cg, cx, f):
    """Synthetic weights matching AttentionBlock.__init__ shapes (eval-mode BN)."""
    ks = jax.random.split(key, 15)
    n = iter(range(15))

    wg = jax.random.normal(ks[next(n)], (f, cg), jnp.float32) * 0.3   # Conv2d(cg->f)
    wx = jax.random.normal(ks[next(n)], (f, cx), jnp.float32) * 0.3   # Conv2d(cx->f)
    wp = jax.random.normal(ks[next(n)], (f,), jnp.float32) * 0.3      # Conv2d(f->1)

    def bn(dim):
        gamma = 1.0 + 0.1 * jax.random.normal(ks[next(n)], (dim,), jnp.float32)
        beta = 0.1 * jax.random.normal(ks[next(n)], (dim,), jnp.float32)
        mean = 0.1 * jax.random.normal(ks[next(n)], (dim,), jnp.float32)
        var = jnp.abs(jax.random.normal(ks[next(n)], (dim,), jnp.float32)) + 0.5
        return (gamma, beta, mean, var)

    return {"wg": wg, "wx": wx, "wp": wp, "bn_g": bn(f), "bn_x": bn(f), "bn_p": bn(1)}


def fold_params(raw, eps=1e-5):
    """Fold eval-mode BN affines into the 1x1 conv weights for the kernel."""
    def fold(gamma, beta, mean, var):
        a = gamma / jnp.sqrt(var + eps)
        return a, beta - mean * a

    ag, bg = fold(*raw["bn_g"])
    ax, bx = fold(*raw["bn_x"])
    ap, bp = fold(*raw["bn_p"])
    return {
        "wg": raw["wg"] * ag[:, None],          # (F, Cg)
        "wx": raw["wx"] * ax[:, None],          # (F, Cx)
        "b": (bg + bx)[:, None],                # (F, 1)
        "wp": (raw["wp"] * ap)[:, None],        # (F, 1)
        "bp": bp.reshape((1,)),                 # (1,)  -> SMEM scalar
    }


# ---------------------------------------------------------------------------
# Pure-JAX reference (unfolded conv + BN, matching the PyTorch module)
# ---------------------------------------------------------------------------
def attention_block_ref(g, x, raw, eps=1e-5):
    def conv1x1(inp, w):                        # w: (Cout, Cin)
        return jnp.einsum("oc,nchw->nohw", w, inp)

    def bn(inp, p):
        gamma, beta, mean, var = p
        inv = gamma / jnp.sqrt(var + eps)
        return (inp - mean[None, :, None, None]) * inv[None, :, None, None] \
            + beta[None, :, None, None]

    g1 = bn(conv1x1(g, raw["wg"]), raw["bn_g"])
    x1 = bn(conv1x1(x, raw["wx"]), raw["bn_x"])
    r = jnp.maximum(g1 + x1, 0.0)
    psi = jax.nn.sigmoid(bn(conv1x1(r, raw["wp"][None, :]), raw["bn_p"]))
    return x * psi


if __name__ == "__main__":
    key = jax.random.PRNGKey(0)
    kg, kx, kp = jax.random.split(key, 3)

    N, Cg, Cx, F, H, W = 2, 4, 4, 8, 16, 16
    g = jax.random.normal(kg, (N, Cg, H, W), jnp.float32)
    x = jax.random.normal(kx, (N, Cx, H, W), jnp.float32)

    raw = make_raw_params(kp, Cg, Cx, F)
    params = fold_params(raw)
    ref = attention_block_ref(g, x, raw)

    # 1) Default auto-tiled path (f32).
    out = jax.block_until_ready(attention_block_pallas(g, x, params))
    assert out.shape == (N, Cx, H, W)
    assert jnp.allclose(out, ref, atol=1e-4, rtol=1e-4)

    # 2) Batch-packed path (bn > 1 images per grid step).
    g4 = jnp.concatenate([g, 0.5 * g], axis=0)
    x4 = jnp.concatenate([x, -0.25 * x], axis=0)
    ref4 = attention_block_ref(g4, x4, raw)
    out4 = jax.block_until_ready(attention_block_pallas(g4, x4, params))
    assert jnp.allclose(out4, ref4, atol=1e-4, rtol=1e-4)

    # 3) Multi pixel-tile path (tiny VMEM budget forces 128-pixel tiles).
    out_t = jax.block_until_ready(
        attention_block_pallas(g, x, params, vmem_budget_bytes=64 * 1024))
    assert jnp.allclose(out_t, ref, atol=1e-4, rtol=1e-4)

    # 4) bf16 I/O path (f32 accumulation inside the kernel).
    out_bf16 = jax.block_until_ready(
        attention_block_pallas(g.astype(jnp.bfloat16), x.astype(jnp.bfloat16), params))
    assert out_bf16.dtype == jnp.bfloat16
    assert jnp.allclose(out_bf16.astype(jnp.float32), ref, atol=5e-2, rtol=5e-2)

    print("KERNEL_OK")
</pallas_src>

<mosaic_0001>
module attributes {stable_mosaic.version = 11 : i64} {
  func.func @_attention_kernel(%arg0: i32, %arg1: i32, %arg2: memref<1x4x256xf32, #tpu.memory_space<vmem>>, %arg3: memref<1x4x256xf32, #tpu.memory_space<vmem>>, %arg4: memref<8x4xf32, #tpu.memory_space<vmem>>, %arg5: memref<8x4xf32, #tpu.memory_space<vmem>>, %arg6: memref<8x1xf32, #tpu.memory_space<vmem>>, %arg7: memref<8x1xf32, #tpu.memory_space<vmem>>, %arg8: memref<1xf32, #tpu.memory_space<smem>>, %arg9: memref<1x4x256xf32, #tpu.memory_space<vmem>>) attributes {dimension_semantics = [#tpu.dimension_semantics<parallel>, #tpu.dimension_semantics<parallel>], iteration_bounds = array<i64: 2, 1>, scalar_prefetch = 0 : i64, scratch_operands = 0 : i64, tpu.core_type = #tpu.core_type<tc>, window_params = [{transform_indices = @transform_0, window_bounds = array<i64: 1, 4, 256>}, {transform_indices = @transform_1, window_bounds = array<i64: 1, 4, 256>}, {pipeline_mode = #tpu.pipeline_mode<synchronous>, transform_indices = @transform_2, window_bounds = array<i64: 8, 4>}, {pipeline_mode = #tpu.pipeline_mode<synchronous>, transform_indices = @transform_3, window_bounds = array<i64: 8, 4>}, {pipeline_mode = #tpu.pipeline_mode<synchronous>, transform_indices = @transform_4, window_bounds = array<i64: 8, 1>}, {pipeline_mode = #tpu.pipeline_mode<synchronous>, transform_indices = @transform_5, window_bounds = array<i64: 8, 1>}, {transform_indices = @transform_6, window_bounds = array<i64: 1>}, {transform_indices = @transform_7, window_bounds = array<i64: 1, 4, 256>}]} {
    %c0 = arith.constant 0 : index
    %c0_0 = arith.constant 0 : index
    %0 = vector.load %arg4[%c0, %c0_0] : memref<8x4xf32, #tpu.memory_space<vmem>>, vector<8x4xf32>
    %c0_1 = arith.constant 0 : index
    %c0_2 = arith.constant 0 : index
    %1 = vector.load %arg5[%c0_1, %c0_2] : memref<8x4xf32, #tpu.memory_space<vmem>>, vector<8x4xf32>
    %c0_3 = arith.constant 0 : index
    %c0_4 = arith.constant 0 : index
    %2 = vector.load %arg6[%c0_3, %c0_4] : memref<8x1xf32, #tpu.memory_space<vmem>>, vector<8x1xf32>
    %c0_5 = arith.constant 0 : index
    %c0_6 = arith.constant 0 : index
    %3 = vector.load %arg7[%c0_5, %c0_6] : memref<8x1xf32, #tpu.memory_space<vmem>>, vector<8x1xf32>
    %c0_7 = arith.constant 0 : index
    %4 = memref.load %arg8[%c0_7] : memref<1xf32, #tpu.memory_space<smem>>
    %c0_8 = arith.constant 0 : index
    %c0_9 = arith.constant 0 : index
    %c0_10 = arith.constant 0 : index
    %5 = vector.load %arg2[%c0_8, %c0_9, %c0_10] : memref<1x4x256xf32, #tpu.memory_space<vmem>>, vector<1x4x256xf32>
    %6 = vector.shape_cast %5 : vector<1x4x256xf32> to vector<4x256xf32>
    %c0_11 = arith.constant 0 : index
    %c0_12 = arith.constant 0 : index
    %c0_13 = arith.constant 0 : index
    %7 = vector.load %arg3[%c0_11, %c0_12, %c0_13] : memref<1x4x256xf32, #tpu.memory_space<vmem>>, vector<1x4x256xf32>
    %8 = vector.shape_cast %7 : vector<1x4x256xf32> to vector<4x256xf32>
    %cst = arith.constant dense<0.000000e+00> : vector<8x256xf32>
    %9 = tpu.matmul %0, %6, %cst {dimension_numbers = #tpu.dot_dimension_numbers<[1], [0], [0], [1], [0, 0, 1, 1], [], []>} : vector<8x4xf32>, vector<4x256xf32>, vector<8x256xf32> -> vector<8x256xf32>
    %cst_14 = arith.constant dense<0.000000e+00> : vector<8x256xf32>
    %10 = tpu.matmul %1, %8, %cst_14 {dimension_numbers = #tpu.dot_dimension_numbers<[1], [0], [0], [1], [0, 0, 1, 1], [], []>} : vector<8x4xf32>, vector<4x256xf32>, vector<8x256xf32> -> vector<8x256xf32>
    %11 = arith.addf %9, %10 : vector<8x256xf32>
    %12 = vector.broadcast %2 : vector<8x1xf32> to vector<8x256xf32>
    %13 = arith.addf %11, %12 : vector<8x256xf32>
    %cst_15 = arith.constant 0.000000e+00 : f32
    %14 = vector.broadcast %cst_15 : f32 to vector<8x256xf32>
    %15 = arith.maximumf %13, %14 : vector<8x256xf32>
    %16 = vector.broadcast %3 : vector<8x1xf32> to vector<8x256xf32>
    %17 = arith.mulf %15, %16 : vector<8x256xf32>
    %cst_16 = arith.constant dense<0.000000e+00> : vector<256xf32>
    %18 = vector.multi_reduction <add>, %17, %cst_16 [0] : vector<8x256xf32> to vector<256xf32>
    %19 = vector.shape_cast %18 : vector<256xf32> to vector<1x256xf32>
    %20 = vector.broadcast %4 : f32 to vector<1x256xf32>
    %21 = arith.addf %19, %20 : vector<1x256xf32>
    %22 = arith.negf %21 : vector<1x256xf32>
    %23 = math.exp %22 : vector<1x256xf32>
    %cst_17 = arith.constant 1.000000e+00 : f32
    %24 = vector.broadcast %cst_17 : f32 to vector<1x256xf32>
    %25 = arith.addf %24, %23 : vector<1x256xf32>
    %26 = arith.divf %24, %25 : vector<1x256xf32>
    %27 = vector.broadcast %26 : vector<1x256xf32> to vector<4x256xf32>
    %28 = arith.mulf %8, %27 : vector<4x256xf32>
    %c0_18 = arith.constant 0 : index
    %c0_19 = arith.constant 0 : index
    %c0_20 = arith.constant 0 : index
    %29 = vector.load %arg9[%c0_18, %c0_19, %c0_20] : memref<1x4x256xf32, #tpu.memory_space<vmem>>, vector<1x4x256xf32>
    %30 = vector.shape_cast %29 : vector<1x4x256xf32> to vector<4x256xf32>
    %31 = vector.shape_cast %28 : vector<4x256xf32> to vector<1x4x256xf32>
    tpu.vector_store %arg9[%c0_18, %c0_19, %c0_20], %31 {strides = array<i32>} : memref<1x4x256xf32, #tpu.memory_space<vmem>>, vector<1x4x256xf32>,
    return
  }
  func.func @transform_0(%arg0: i32, %arg1: i32) -> (i32, i32, i32) {
    %c0_i32 = arith.constant 0 : i32
    %c0_i32_0 = arith.constant 0 : i32
    return %arg0, %c0_i32, %arg1 : i32, i32, i32
  }
  func.func @transform_1(%arg0: i32, %arg1: i32) -> (i32, i32, i32) {
    %c0_i32 = arith.constant 0 : i32
    %c0_i32_0 = arith.constant 0 : i32
    return %arg0, %c0_i32, %arg1 : i32, i32, i32
  }
  func.func @transform_2(%arg0: i32, %arg1: i32) -> (i32, i32) {
    %c0_i32 = arith.constant 0 : i32
    %c0_i32_0 = arith.constant 0 : i32
    %c0_i32_1 = arith.constant 0 : i32
    return %c0_i32, %c0_i32_0 : i32, i32
  }
  func.func @transform_3(%arg0: i32, %arg1: i32) -> (i32, i32) {
    %c0_i32 = arith.constant 0 : i32
    %c0_i32_0 = arith.constant 0 : i32
    %c0_i32_1 = arith.constant 0 : i32
    return %c0_i32, %c0_i32_0 : i32, i32
  }
  func.func @transform_4(%arg0: i32, %arg1: i32) -> (i32, i32) {
    %c0_i32 = arith.constant 0 : i32
    %c0_i32_0 = arith.constant 0 : i32
    %c0_i32_1 = arith.constant 0 : i32
    return %c0_i32, %c0_i32_0 : i32, i32
  }
  func.func @transform_5(%arg0: i32, %arg1: i32) -> (i32, i32) {
    %c0_i32 = arith.constant 0 : i32
    %c0_i32_0 = arith.constant 0 : i32
    %c0_i32_1 = arith.constant 0 : i32
    return %c0_i32, %c0_i32_0 : i32, i32
  }
  func.func @transform_6(%arg0: i32, %arg1: i32) -> i32 {
    %c0_i32 = arith.constant 0 : i32
    %c0_i32_0 = arith.constant 0 : i32
    return %c0_i32 : i32
  }
  func.func @transform_7(%arg0: i32, %arg1: i32) -> (i32, i32, i32) {
    %c0_i32 = arith.constant 0 : i32
    %c0_i32_0 = arith.constant 0 : i32
    return %arg0, %c0_i32, %arg1 : i32, i32, i32
  }
}

</mosaic_0001>

<bundles_post_ra>
// kernel: tpu_custom_call.1
= control target key start
LH: loop header
LB: loop body
LE: loop exit
PB: predicated region body
PF: predicated region fallthrough
CT: control target
= control target key end

     0   :  { %s1029_s0 = inlined_call_operand.vmem [shape: f32[2,4,256], index: 0, kind: input, shape index: {}]   ;;  %s1030_s1 = inlined_call_operand.vmem [shape: f32[2,4,256], index: 1, kind: input, shape index: {}]   ;;  %s1031_s2 = inlined_call_operand.vmem [shape: f32[8,4], index: 2, kind: input, shape index: {}]   ;;  %s1032_s3 = inlined_call_operand.vmem [shape: f32[8,4], index: 3, kind: input, shape index: {}]   ;;  %s1033_s4 = inlined_call_operand.vmem [shape: f32[8,1], index: 4, kind: input, shape index: {}]   ;;  %s1034_s5 = inlined_call_operand.vmem [shape: f32[8,1], index: 5, kind: input, shape index: {}]   ;;  %s1035_s6 = inlined_call_operand.<no memory space> [shape: f32[1], index: 6, kind: input, shape index: {}]   ;;  %s1036_s7 = inlined_call_operand.hbm [shape: f32[2,4,256], index: 7, kind: output, shape index: {}]  }
   0x1   :  { %12 = sst [smem:[#allocation2]] %s1035_s6 }
   0x2   :  { %13 = vsyncpa [#allocation4], 0 }
   0x3   :  { %15 = vsyncpa [#allocation4 + $0x1], 0  ;;  %s896_s26 = smov 0   ;;  %s898_s27 = smov 0  }
   0x4   :  { %s900_s28 = smov 0   ;;  %s902_s29 = smov 0  }
   0x5   :  { %s904_s30 = smov 0   ;;  %s906_s8 = smov 0  }
   0x6 LB: > { %s674_s6 = sadd.s32 4294967295, %s848_s8   ;;  %s675_s9 = sadd.s32 4294967294, %s848_s8   ;;  %s848_s8 = sphi %s906_s8, %s21_s8   ;;  %s844_s30 = sphi %s904_s30, %s1043_s30   ;;  %s840_s29 = sphi %s902_s29, %s1042_s29   ;;  %s836_s28 = sphi %s900_s28, %s1041_s28   ;;  %s832_s27 = sphi %s898_s27, %s1040_s27   ;;  %s828_s26 = sphi %s896_s26, %s1039_s26  }
   0x7   : > { %s33_s10 = sadd.s32 1, %s844_s30  ;;  %s203_s11 = sadd.s32 1, %s836_s28 }
   0x8   : > { %p35_p0 = scmp.ge.s32.totalorder %s33_s10, 2  ;;  %p213_p1 = scmp.ne.s32.totalorder %s836_s28, %s832_s27 }
   0x9   : > { %p214_p2 = scmp.eq.s32.totalorder %s674_s6, 1  ;;  %p219_p3 = scmp.ne.s32.totalorder %s832_s27, %s828_s26 }
   0xa   : > { %s1045_s10 = smov (%p35_p0, %s33_s10), 0  ;;  %p220_p5 = scmp.eq.s32.totalorder %s675_s9, 1 }
   0xb   : > { %p936_p4 = por %p214_p2, %p213_p1  ;;  %s198_s13 = ssub.s32 %s844_s30, %s1045_s10 }
   0xc   : > { %p678_p6 = scmp.ge.s32.totalorder %s848_s8, 1  ;;  %p201_p7 = scmp.eq.s32.totalorder %s198_s13, 0 }
   0xd   : > { %p943_p8 = por %p220_p5, %p219_p3  ;;  %p279_p9 = scmp.lt.s32.totalorder %s848_s8, 3 }
   0xe   : > { %s949_s15 = scalar_select %p201_p7, %s836_s28, %s203_s11  }
   0xf   : > { %p280_p10 = pnand %p678_p6, %p279_p9 }
  0x10   : > { %p325_p11 = scmp.lt.s32.totalorder (!%p280_p10), %s840_s29, 1  ;;  %v850_v0 = vmov (!%p280_p10), 0.0   ;;  %v347_v1 = vld [vmem:[%s1033_s4] sm:$0xff] (!%p280_p10)  ;;  %v851_v2 = vmov (!%p280_p10), 0   ;;  %vm358_vm0 = vcmask (!%p280_p10), 1043456   ;;  %vm354_vm1 = vcmask (!%p280_p10), 31744  }
  0x11   : > { %283 = sbr.rel (%p280_p10) target bundleno = 313 (0x139), region = 48  ;;  %427 = vmatprep.mubr.f32.mxu1 (!%p280_p10), %v850_v0  ;;  %507 = vmatprep.mubr.f32.mxu0 (!%p280_p10), %v850_v0  ;;  %v348_v3 = vld [vmem:[%s1034_s5] sm:$0xff] (!%p280_p10)  ;;  %s699_s21 = sshll.u32 (!%p280_p10), %s840_s29, 7 }
  0x12   : > { %759 = vset.pattern.permute.xlu0 (!%p280_p10), %v851_v2  ;;  %v346_v8 = vld [vmem:[%s1032_s3] sm:$0xff] (!%p280_p10)  ;;  %s982_s6 = scalar_lea.hbm (!%p280_p10), %s1036_s7, %s699_s21 }
  0x13   : > { %516 = vperm.xlu0 (!%p280_p10), %759, %v347_v1   ;;  %v345_v9 = vld [vmem:[%s1031_s2] sm:$0xff] (!%p280_p10) }
  0x17   : > { %525 = vperm.xlu0 (!%p280_p10), %759, %v348_v3  }
  0x18   : > { %s326_s18 = scalar_select %p325_p11, %s840_s29, 1 }
  0x19   : > { %s852_s29 = smov [#allocation3]  }
  0x1a   : > { %s697_s19 = sshll.u32 %s326_s18, 3  ;;  %s349_s18 = sld [smem:[#allocation2]] }
  0x1b   : > { %s342_s24 = scalar_lea.vmem %s1030_s1, %s697_s19  ;;  %s332_s9 = scalar_lea.vmem %s1029_s0, %s697_s19 }
  0x1c   : > { %v965_v4 = vld [vmem:[%s342_s24] sm:$0xff]  ;;  %s321_s19 = sand.u32 1, %s832_s27   ;;  %s774_s13 = sshll.u32 %s852_s29, 4  ;;  %s775_s13 = int_to_ptr.vmem [resolvable:$false] %s774_s13 }
  0x1d   : > { %v350_v5 = vld [vmem:[%s332_s9] sm:$0xff]  ;;  %v353_v6 = vcombine.high %v965_v4, %v965_v4  ;;  %s679_s20 = sshll.u32 %s321_s19, 3  ;;  %s564_s9 = scalar_lea.sflag [#allocation4], %s321_s19 }
  0x1e   : > { %v435_v7 = vcombine.high %v350_v5, %v350_v5  ;;  %s323_s22 = scalar_lea.vmem [#allocation3], %s679_s20  ;;  %s776_s16 = scalar_lea.vmem %s775_s13, 256 }
  0x1f   : > { %684 = vmatprep.subr.msk.mxu1 %vm358_vm0, %v353_v6  ;;  %s580_s23 = sshll.u32 %s323_s22, 4  ;;  %s984_s23 = int_to_ptr.vmem [resolvable:$true] %s580_s23 }
  0x20   : > { %687 = vmatprep.subr.msk.mxu0 %vm358_vm0, %v435_v7  ;;  %685 = vmatpush1.msk.msra.mxu1 %vm358_vm0, %v965_v4  ;;  %v542_v33 = vstv %s349_s18  ;;  %s770_s11 = scalar_lea.vmem %s984_s23, 128  ;;  %p777_p1 = scmp.lt.s32.totalorder %s984_s23, %s775_s13 }
  0x21   : > { %688 = vmatpush1.msk.msra.mxu0 %vm358_vm0, %v350_v5  ;;  %686 = vmatmul.mubr.msk.f32.vlgmr.msra.gmra.mrb[0].mxu1 %vm354_vm1, %v346_v8  ;;  %p771_p12 = scmp.ne.s32.totalorder %s984_s23, %s770_s11  ;;  %p778_p2 = scmp.lt.s32.totalorder %s776_s16, %s770_s11 }
  0x22   : > { %689 = vmatmul.mubr.msk.f32.vlgmr.msra.gmra.mrb[0].mxu0 %vm354_vm1, %v345_v9 }
  0x23   : > { %p772_p13 = pnand %p771_p12, %p936_p4  ;;  %p779_p3 = por %p778_p2, %p777_p1 }
  0x25   : > { %p773_p0 = pneg %p772_p13 }
  0x27   : > { %p780_p5 = pnand %p779_p3, %p773_p0 }
  0x92   : > { %v517_v10 = vpop.permute.xlu0 %516 }
  0x96   : > { %v526_v20 = vpop.permute.xlu0 %525 }
  0xf4   : > { %v429_v11 = vpop.f32.mrb[0].mxu1 }
  0xf5   : > { %v509_v12 = vpop.f32.mrb[0].mxu0  ;;  %v431_v14 = vpop.f32.mrb[1].mxu1 }
  0xf6   : > { %v510_v13 = vadd.f32 %v509_v12, %v429_v11  ;;  %v511_v15 = vpop.f32.mrb[1].mxu0 }
  0xf7   : > { %v512_v16 = vadd.f32 %v511_v15, %v431_v14 }
  0xf8   : > { %v519_v17 = vadd.f32 %v517_v10, %v510_v13 }
  0xf9   : > { %v520_v18 = vadd.f32 %v517_v10, %v512_v16 }
  0xfa   : > { %v521_v19 = vmax.f32 %v519_v17, 0.0 }
  0xfb   : > { %v522_v21 = vmax.f32 %v520_v18, 0.0 }
  0xfc   : > { %v528_v22 = vmul.f32 %v526_v20, %v521_v19 }
  0xfd   : > { %v529_v23 = vmul.f32 %v526_v20, %v522_v21 }
  0xfe   : > { %v530_v24 = vrot.slane %v528_v22, 4 }
  0xff   : > { %v536_v25 = vrot.slane %v529_v23, 4 }
 0x100   : > { %v531_v26 = vadd.f32 %v530_v24, %v528_v22 }
 0x101   : > { %v537_v27 = vadd.f32 %v536_v25, %v529_v23 }
 0x102   : > { %v532_v28 = vrot.slane %v531_v26, 2 }
 0x103   : > { %v538_v29 = vrot.slane %v537_v27, 2 }
 0x104   : > { %v533_v30 = vadd.f32 %v532_v28, %v531_v26 }
 0x105   : > { %v539_v31 = vadd.f32 %v538_v29, %v537_v27 }
 0x106   : > { %v534_v32 = vrot.slane %v533_v30, 1 }
 0x107   : > { %v540_v34 = vrot.slane %v539_v31, 1 }
 0x108   : > { %v535_v35 = vadd.f32 %v534_v32, %v533_v30 }
 0x109   : > { %v541_v36 = vadd.f32 %v540_v34, %v539_v31 }
 0x10a   : > { %v543_v37 = vadd.f32 %v542_v33, %v535_v35 }
 0x10b   : > { %v544_v38 = vadd.f32 %v542_v33, %v541_v36 }
 0x10c   : > { %v690_v39 = vmul.f32 -1.442695, %v543_v37 }
 0x10d   : > { %v691_v40 = vmul.f32 -1.442695, %v544_v38 }
 0x10e   : > { %762 = vpow2.f32 %v690_v39 }
 0x10f   : > { %764 = vpow2.f32 %v691_v40 }
 0x118   : > { %v763_v41 = vpop.eup %762 }
 0x119   : > { %v765_v42 = vpop.eup %764  ;;  %v551_v43 = vadd.f32 1.0, %v763_v41 }
 0x11a   : > { %v552_v44 = vadd.f32 1.0, %v765_v42 }
 0x11b   : > { %766 = vrcp.f32 %v551_v43 }
 0x11c   : > { %768 = vrcp.f32 %v552_v44 }
 0x125   : > { %v767_v45 = vpop.eup %766 }
 0x126   : > { %v769_v46 = vpop.eup %768 }
 0x127   : > { %v559_v47 = vcombine.low %v767_v45, %v769_v46 }
 0x129   : > { %v561_v48 = vmul.f32 %v559_v47, %v965_v4 }
 0x12b   : > { %562 = vst [vmem:[%s323_s22] sm:$0xff] %v561_v48 }
 0x12c   : > { %783 = shalt.err (!%p780_p5)
}
 0x12d   : > { %s784_s17 = scalar_lea.hbm %s982_s6, 128  ;;  %s788_s20 = scalar_lea.hbm %s1036_s7, 256 }
 0x12e   : > { %p785_p6 = scmp.ne.s32.totalorder %s982_s6, %s784_s17  ;;  %p789_p10 = scmp.lt.u32.totalorder %s982_s6, %s1036_s7 }
 0x12f   : > { %p790_p11 = scmp.lt.u32.totalorder %s788_s20, %s784_s17  ;;  %p792_p13 = scmp.lt.u32.totalorder %s784_s17, %s982_s6 }
 0x130   : > { %p786_p7 = pnand %p785_p6, %p936_p4 }
 0x131   : > { %p791_p12 = por %p790_p11, %p789_p10 }
 0x132   : > { %p787_p9 = pneg %p786_p7 }
 0x133   : > { %p793_p0 = por %p792_p13, %p791_p12 }
 0x135   : > { %p794_p1 = pnand %p793_p0, %p787_p9 }
 0x137   : > { %797 = shalt.err (!%p794_p1)
}
 0x138   : > { %702 = dma.vmem_to_hbm [thread:$0]  (%p936_p4), %s984_s23, 128, %s982_s6, %s564_s9  }
 0x139 PF: > { %p708_p2 = scmp.ge.s32.totalorder %s848_s8, 2  ;;  %s592_s24 = sand.u32 1, %s828_s26  }
 0x13a   : > { %s593_s25 = scalar_lea.sflag [#allocation4], %s592_s24 }
 0x13b   : > { %p705_p3 = pnand %p708_p2, %p943_p8 }
 0x13d   : > { %823 = dma.done.wait (!%p705_p3), %s593_s25, 128  }
 0x13e   : > { %825 = vsyncadd (!%p705_p3), %s593_s25, 4294967168  ;;  %s21_s8 = sadd.s32 1, %s848_s8   ;;  %s1039_s26 = smov %s832_s27 }
 0x13f   : > { %p18_p5 = scmp.ge.s32.totalorder %s21_s8, 4   ;;  %s1040_s27 = smov %s836_s28 }
 0x140   : > { %s1041_s28 = smov %s949_s15  ;;  %s1042_s29 = smov %s844_s30 }
 0x141   : > { %s1043_s30 = smov %s1045_s10  ;;  %20 = sbr.rel (!%p18_p5) target bundleno = 6 (0x6), region = 86 }
 0x148   :  { %598 = vsyncpa [#allocation4], 1 }
 0x149   :  { %600 = vsyncpa [#allocation4 + $0x1], 1 }

</bundles_post_ra>
